<compile_context>
chip_gen: v6e
topology: v6e:2x2x1
jax: 0.10.0
libtpu: 0.0.40
codegen_flags: <defaults>
</compile_context>

<pallas_src>
import functools

import jax
import jax.numpy as jnp
from jax.experimental import pallas as pl
from jax.experimental.pallas import tpu as pltpu

EPS = 1e-5  # matches the module's eps=1e-05


# ----------------------------------------------------------------------------
# Hardware-aware budgets
# ----------------------------------------------------------------------------
def _vmem_capacity_bytes():
    try:
        info = pltpu.get_tpu_info()
        cap = getattr(info, "vmem_capacity_bytes", None)
        if cap:
            return int(cap)
    except Exception:
        pass
    return 64 << 20  # conservative (v7x per-TensorCore figure)


def _budgets():
    cap = _vmem_capacity_bytes()
    if cap >= (96 << 20):          # v5e / v6e: 128 MiB physical VMEM
        return 64 << 20, 8 << 20   # (vmem_limit_bytes, per-buffer tile budget)
    return 48 << 20, 4 << 20       # v7x: 64 MiB per TensorCore


# ----------------------------------------------------------------------------
# Fused single-pass kernel: stats + mix + normalize, 1 read + 1 write of x.
# Grid: (C_pad // tc,).  x block: (N, L, tc).
# ----------------------------------------------------------------------------
def _make_fused_kernel(N, L):
    inv_l = 1.0 / L
    # torch.var is unbiased; for L == 1 it is NaN (0/0) -> propagate NaN.
    inv_lm1 = 1.0 / (L - 1) if L > 1 else float("nan")

    def fused_kernel(perm_ref, alpha_ref, x_ref, o_ref,
                     mean_s, var_s, scale_s, shift_s):
        x = x_ref[...].astype(jnp.float32)                      # (N, L, tc)
        s = jnp.sum(x, axis=1, keepdims=True)                   # (N, 1, tc)
        m = s * inv_l
        sq = jnp.sum(x * x, axis=1, keepdims=True)
        mean_s[...] = m
        var_s[...] = jnp.maximum(sq - s * m, 0.0) * inv_lm1

        alpha = alpha_ref[0]

        def body(n, carry):
            p = perm_ref[n]                                      # SMEM scalar
            m_n = mean_s[n]                                      # (1, tc)
            v_n = var_s[n]
            m_p = mean_s[p]                                      # partner stats
            v_p = var_s[p]
            m_mix = alpha * m_n + (1.0 - alpha) * m_p
            v_mix = alpha * v_n + (1.0 - alpha) * v_p
            scale = jax.lax.rsqrt(v_n + EPS) * jnp.sqrt(v_mix + EPS)
            scale_s[n] = scale
            shift_s[n] = m_mix - m_n * scale
            return carry

        jax.lax.fori_loop(0, N, body, 0)

        xo = x_ref[...].astype(jnp.float32)
        o_ref[...] = (xo * scale_s[...] + shift_s[...]).astype(o_ref.dtype)

    return fused_kernel


# ----------------------------------------------------------------------------
# Two-pass fallback.
# Pass 1: one-pass sum / sum-of-squares stats (L axis is an "arbitrary"
#         reduction grid axis; accumulate directly in the resident outputs).
# ----------------------------------------------------------------------------
def _make_stats_kernel(L):
    inv_l = 1.0 / L
    inv_lm1 = 1.0 / (L - 1) if L > 1 else float("nan")

    def stats_kernel(x_ref, mean_ref, var_ref):
        l = pl.program_id(2)

        @pl.when(l == 0)
        def _():
            mean_ref[...] = jnp.zeros_like(mean_ref)
            var_ref[...] = jnp.zeros_like(var_ref)

        x = x_ref[...].astype(jnp.float32)                       # (bn, tl, tc)
        mean_ref[...] += jnp.sum(x, axis=1, keepdims=True)       # running sum
        var_ref[...] += jnp.sum(x * x, axis=1, keepdims=True)    # running sumsq

        @pl.when(l == pl.num_programs(2) - 1)
        def _():
            s = mean_ref[...]
            m = s * inv_l
            v = jnp.maximum(var_ref[...] - s * m, 0.0) * inv_lm1
            mean_ref[...] = m
            var_ref[...] = v

    return stats_kernel


# Pass 2: single FMA per element; scale/shift pre-folded in JAX.
def apply_kernel(x_ref, scale_ref, shift_ref, o_ref):
    x = x_ref[...].astype(jnp.float32)                           # (bn, tl, tc)
    o_ref[...] = (x * scale_ref[...] + shift_ref[...]).astype(o_ref.dtype)


# ----------------------------------------------------------------------------
# Tile selection
# ----------------------------------------------------------------------------
def _choose_fused_tc(N, L, C_pad, itemsize, budget_bytes):
    """Largest mult-of-128 divisor of C_pad s.t. (x-in + out, double-buffered)
    plus scratch fits the fused-path budget.  None -> fused path infeasible."""
    divs = [d for d in range(128, C_pad + 1, 128) if C_pad % d == 0]
    fitting = [d for d in divs
               if 4 * N * L * d * itemsize + 4 * N * d * 4 <= budget_bytes]
    if not fitting:
        return None
    tc = fitting[-1]
    # Prefer >=2 grid steps for megacore sharding on v7x when possible.
    if tc == C_pad and len(fitting) > 1:
        tc = fitting[-2]
    return tc


def _choose_tiles(N, L, C_pad, per_buf_bytes):
    """(bn, tl, tc) for the two-pass path; bn|N, tl|L (tl mult of 8 or == L),
    tc|C_pad (mult of 128)."""
    budget_elems = max(per_buf_bytes // 4, 8 * 128)
    c_divs = [d for d in range(128, C_pad + 1, 128) if C_pad % d == 0]

    tc = 128
    for d in reversed(c_divs):
        if L * d <= budget_elems:
            tc = d
            break

    if L * tc <= budget_elems:
        tl = L
    else:
        tl = None
        for d in range(8, L + 1, 8):
            if L % d == 0 and d * tc <= budget_elems:
                tl = d
        if tl is None:
            # TODO(synk): no multiple-of-8 divisor of L fits the budget
            # (e.g. huge prime L); fall back to a full-L tile.
            tl = L

    bn = 1
    for d in range(1, N + 1):
        if N % d == 0 and d * tl * tc <= budget_elems:
            bn = d

    # Keep >=2 parallel grid steps for megacore sharding on v7x when possible.
    if N // bn == 1 and C_pad // tc == 1 and N > 1:
        for d in range(N // 2, 0, -1):
            if N % d == 0:
                bn = d
                break
    return bn, tl, tc


# ----------------------------------------------------------------------------
# Wrapper
# ----------------------------------------------------------------------------
@functools.partial(jax.jit, static_argnames=("force_two_pass",))
def token_randomization(x, alpha, perm, force_two_pass=False):
    """x: (N, L, C); alpha: (1,) f32; perm: (N,) int32 permutation of batch."""
    N, L, C = x.shape
    vmem_limit, per_buf = _budgets()

    # Pad features to a multiple of 128 (lane-dense, unmasked stores).
    C_pad = ((C + 127) // 128) * 128
    x_p = jnp.pad(x, ((0, 0), (0, 0), (0, C_pad - C))) if C_pad != C else x

    alpha_f = jnp.asarray(alpha, jnp.float32).reshape((1,))
    perm_i = jnp.asarray(perm, jnp.int32)

    # ---- Fused single-pass path (1R + 1W of x) ------------------------------
    fused_tc = _choose_fused_tc(N, L, C_pad, x_p.dtype.itemsize,
                                max(vmem_limit - (8 << 20), 0))
    if fused_tc is not None and not force_two_pass:
        tc = fused_tc
        gc = C_pad // tc
        out_p = pl.pallas_call(
            _make_fused_kernel(N, L),
            out_shape=jax.ShapeDtypeStruct((N, L, C_pad), x.dtype),
            grid_spec=pltpu.PrefetchScalarGridSpec(
                num_scalar_prefetch=2,                 # perm, alpha in SMEM
                grid=(gc,),
                in_specs=[pl.BlockSpec((N, L, tc),
                                       lambda c, perm, alpha: (0, 0, c))],
                out_specs=pl.BlockSpec((N, L, tc),
                                       lambda c, perm, alpha: (0, 0, c)),
                scratch_shapes=[pltpu.VMEM((N, 1, tc), jnp.float32)] * 4),
            compiler_params=pltpu.CompilerParams(
                dimension_semantics=("parallel",),
                vmem_limit_bytes=vmem_limit),
        )(perm_i, alpha_f, x_p)
        return out_p[:, :, :C] if C_pad != C else out_p

    # ---- Two-pass path -------------------------------------------------------
    bn, tl, tc = _choose_tiles(N, L, C_pad, per_buf)
    gn, gc, gl = N // bn, C_pad // tc, L // tl

    # Pass 1: stats.
    mean, var = pl.pallas_call(
        _make_stats_kernel(L),
        out_shape=(jax.ShapeDtypeStruct((N, 1, C_pad), jnp.float32),
                   jax.ShapeDtypeStruct((N, 1, C_pad), jnp.float32)),
        grid_spec=pltpu.PrefetchScalarGridSpec(
            num_scalar_prefetch=0,
            grid=(gn, gc, gl),
            in_specs=[pl.BlockSpec((bn, tl, tc), lambda n, c, l: (n, l, c))],
            out_specs=[pl.BlockSpec((bn, 1, tc), lambda n, c, l: (n, 0, c)),
                       pl.BlockSpec((bn, 1, tc), lambda n, c, l: (n, 0, c))]),
        compiler_params=pltpu.CompilerParams(
            dimension_semantics=("parallel", "parallel", "arbitrary"),
            vmem_limit_bytes=vmem_limit),
    )(x_p)

    # Partner gather + alpha mix + fold into per-feature scale/shift (tiny,
    # plain JAX) so pass 2 has no data-dependent index_map and no rsqrt.
    a = alpha_f.reshape(())
    mean_p = jnp.take(mean, perm_i, axis=0)
    var_p = jnp.take(var, perm_i, axis=0)
    mean_mix = a * mean + (1.0 - a) * mean_p
    var_mix = a * var + (1.0 - a) * var_p
    scale = jax.lax.rsqrt(var + EPS) * jnp.sqrt(var_mix + EPS)
    shift = mean_mix - mean * scale

    # Pass 2: out = x * scale + shift.
    out_p = pl.pallas_call(
        apply_kernel,
        out_shape=jax.ShapeDtypeStruct((N, L, C_pad), x.dtype),
        grid_spec=pltpu.PrefetchScalarGridSpec(
            num_scalar_prefetch=0,
            grid=(gn, gc, gl),
            in_specs=[pl.BlockSpec((bn, tl, tc), lambda n, c, l: (n, l, c)),
                      pl.BlockSpec((bn, 1, tc), lambda n, c, l: (n, 0, c)),
                      pl.BlockSpec((bn, 1, tc), lambda n, c, l: (n, 0, c))],
            out_specs=pl.BlockSpec((bn, tl, tc), lambda n, c, l: (n, l, c))),
        compiler_params=pltpu.CompilerParams(
            dimension_semantics=("parallel", "parallel", "parallel"),
            vmem_limit_bytes=vmem_limit),
    )(x_p, scale, shift)

    return out_p[:, :, :C] if C_pad != C else out_p


# ----------------------------------------------------------------------------
# Pure-JAX reference mirroring the PyTorch forward.
# ----------------------------------------------------------------------------
def token_randomization_ref(x, alpha, perm):
    xp = jnp.transpose(x, (0, 2, 1)).astype(jnp.float32)  # (N, C, L)
    mean = jnp.mean(xp, axis=-1, keepdims=True)
    var = jnp.var(xp, axis=-1, keepdims=True, ddof=1)      # torch.var: unbiased
    xn = (xp - mean) / jnp.sqrt(var + EPS)
    a = jnp.asarray(alpha, jnp.float32).reshape(())
    mean_mix = a * mean + (1 - a) * mean[perm]
    var_mix = a * var + (1 - a) * var[perm]
    out = xn * jnp.sqrt(var_mix + EPS) + mean_mix
    return jnp.transpose(out, (0, 2, 1)).astype(x.dtype)   # back to (N, L, C)


if __name__ == "__main__":
    key = jax.random.PRNGKey(0)
    k_x, k_perm, k_x2 = jax.random.split(key, 3)

    # TODO(synk): torch.randperm inside forward is host-side RNG; here the
    # permutation is generated with jax.random and passed in explicitly.

    # Small shape consistent with the module: (batch, tokens, features).
    N, L, C = 2, 8, 32
    x = jax.random.normal(k_x, (N, L, C), dtype=jnp.float32)
    alpha = jnp.array([0.5], dtype=jnp.float32)             # module init: 0.5
    perm = jax.random.permutation(k_perm, N).astype(jnp.int32)

    ref = token_randomization_ref(x, alpha, perm)

    out = jax.block_until_ready(token_randomization(x, alpha, perm))
    assert out.shape == (N, L, C)
    assert jnp.allclose(out, ref, atol=1e-4, rtol=1e-4)

    # Exercise the two-pass (stats + apply) path explicitly as well.
    out_tp = jax.block_until_ready(
        token_randomization(x, alpha, perm, force_two_pass=True))
    assert jnp.allclose(out_tp, ref, atol=1e-4, rtol=1e-4)

    # Lane-dense sanity check (C multiple of 128), both paths.
    N2, L2, C2 = 2, 16, 128
    x2 = jax.random.normal(k_x2, (N2, L2, C2), dtype=jnp.float32)
    perm2 = jnp.array([1, 0], dtype=jnp.int32)
    ref2 = token_randomization_ref(x2, alpha, perm2)

    out2 = jax.block_until_ready(token_randomization(x2, alpha, perm2))
    assert jnp.allclose(out2, ref2, atol=1e-4, rtol=1e-4)
    out2_tp = jax.block_until_ready(
        token_randomization(x2, alpha, perm2, force_two_pass=True))
    assert jnp.allclose(out2_tp, ref2, atol=1e-4, rtol=1e-4)

    print("KERNEL_OK")
</pallas_src>

<mosaic_0001>
module attributes {stable_mosaic.version = 11 : i64} {
  func.func @fused_kernel(%arg0: i32, %arg1: memref<2xi32, #tpu.memory_space<smem>>, %arg2: memref<1xf32, #tpu.memory_space<smem>>, %arg3: memref<2x8x128xf32, #tpu.memory_space<vmem>>, %arg4: memref<2x8x128xf32, #tpu.memory_space<vmem>>, %arg5: memref<2x1x128xf32, #tpu.memory_space<vmem>>, %arg6: memref<2x1x128xf32, #tpu.memory_space<vmem>>, %arg7: memref<2x1x128xf32, #tpu.memory_space<vmem>>, %arg8: memref<2x1x128xf32, #tpu.memory_space<vmem>>) attributes {dimension_semantics = [#tpu.dimension_semantics<parallel>], iteration_bounds = array<i64: 1>, scalar_prefetch = 2 : i64, scratch_operands = 4 : i64, tpu.core_type = #tpu.core_type<tc>, window_params = [{transform_indices = @transform_0, window_bounds = array<i64: 2, 8, 128>}, {transform_indices = @transform_1, window_bounds = array<i64: 2, 8, 128>}]} {
    %c0 = arith.constant 0 : index
    %c0_0 = arith.constant 0 : index
    %c0_1 = arith.constant 0 : index
    %0 = vector.load %arg3[%c0, %c0_0, %c0_1] : memref<2x8x128xf32, #tpu.memory_space<vmem>>, vector<2x8x128xf32>
    %cst = arith.constant dense<0.000000e+00> : vector<2x128xf32>
    %1 = vector.multi_reduction <add>, %0, %cst [1] : vector<2x8x128xf32> to vector<2x128xf32>
    %2 = vector.shape_cast %1 : vector<2x128xf32> to vector<2x1x128xf32>
    %cst_2 = arith.constant 1.250000e-01 : f32
    %3 = vector.broadcast %cst_2 : f32 to vector<2x1x128xf32>
    %4 = arith.mulf %2, %3 : vector<2x1x128xf32>
    %5 = arith.mulf %0, %0 : vector<2x8x128xf32>
    %cst_3 = arith.constant dense<0.000000e+00> : vector<2x128xf32>
    %6 = vector.multi_reduction <add>, %5, %cst_3 [1] : vector<2x8x128xf32> to vector<2x128xf32>
    %7 = vector.shape_cast %6 : vector<2x128xf32> to vector<2x1x128xf32>
    %c0_4 = arith.constant 0 : index
    %c0_5 = arith.constant 0 : index
    %c0_6 = arith.constant 0 : index
    %8 = vector.load %arg5[%c0_4, %c0_5, %c0_6] : memref<2x1x128xf32, #tpu.memory_space<vmem>>, vector<2x1x128xf32>
    tpu.vector_store %arg5[%c0_4, %c0_5, %c0_6], %4 {strides = array<i32>} : memref<2x1x128xf32, #tpu.memory_space<vmem>>, vector<2x1x128xf32>,
    %9 = arith.mulf %2, %4 : vector<2x1x128xf32>
    %10 = arith.subf %7, %9 : vector<2x1x128xf32>
    %cst_7 = arith.constant 0.000000e+00 : f32
    %11 = vector.broadcast %cst_7 : f32 to vector<2x1x128xf32>
    %12 = arith.maximumf %10, %11 : vector<2x1x128xf32>
    %cst_8 = arith.constant 0.142857149 : f32
    %13 = vector.broadcast %cst_8 : f32 to vector<2x1x128xf32>
    %14 = arith.mulf %12, %13 : vector<2x1x128xf32>
    %c0_9 = arith.constant 0 : index
    %c0_10 = arith.constant 0 : index
    %c0_11 = arith.constant 0 : index
    %15 = vector.load %arg6[%c0_9, %c0_10, %c0_11] : memref<2x1x128xf32, #tpu.memory_space<vmem>>, vector<2x1x128xf32>
    tpu.vector_store %arg6[%c0_9, %c0_10, %c0_11], %14 {strides = array<i32>} : memref<2x1x128xf32, #tpu.memory_space<vmem>>, vector<2x1x128xf32>,
    %c0_12 = arith.constant 0 : index
    %16 = memref.load %arg2[%c0_12] : memref<1xf32, #tpu.memory_space<smem>>
    %c0_i32 = arith.constant 0 : i32
    %c2_i32 = arith.constant 2 : i32
    %17 = arith.addi %c0_i32, %c2_i32 : i32
    %c1_i32 = arith.constant 1 : i32
    scf.for %arg9 = %c0_i32 to %17 step %c1_i32  : i32 {
      %26 = arith.index_cast %arg9 : i32 to index
      %27 = memref.load %arg1[%26] : memref<2xi32, #tpu.memory_space<smem>>
      %28 = arith.index_cast %arg9 : i32 to index
      %c0_26 = arith.constant 0 : index
      %c0_27 = arith.constant 0 : index
      %29 = vector.load %arg5[%28, %c0_26, %c0_27] : memref<2x1x128xf32, #tpu.memory_space<vmem>>, vector<1x1x128xf32>
      %30 = vector.shape_cast %29 : vector<1x1x128xf32> to vector<1x128xf32>
      %31 = arith.index_cast %arg9 : i32 to index
      %c0_28 = arith.constant 0 : index
      %c0_29 = arith.constant 0 : index
      %32 = vector.load %arg6[%31, %c0_28, %c0_29] : memref<2x1x128xf32, #tpu.memory_space<vmem>>, vector<1x1x128xf32>
      %33 = vector.shape_cast %32 : vector<1x1x128xf32> to vector<1x128xf32>
      %34 = arith.index_cast %27 : i32 to index
      %c0_30 = arith.constant 0 : index
      %c0_31 = arith.constant 0 : index
      %35 = vector.load %arg5[%34, %c0_30, %c0_31] : memref<2x1x128xf32, #tpu.memory_space<vmem>>, vector<1x1x128xf32>
      %36 = vector.shape_cast %35 : vector<1x1x128xf32> to vector<1x128xf32>
      %37 = arith.index_cast %27 : i32 to index
      %c0_32 = arith.constant 0 : index
      %c0_33 = arith.constant 0 : index
      %38 = vector.load %arg6[%37, %c0_32, %c0_33] : memref<2x1x128xf32, #tpu.memory_space<vmem>>, vector<1x1x128xf32>
      %39 = vector.shape_cast %38 : vector<1x1x128xf32> to vector<1x128xf32>
      %40 = vector.broadcast %16 : f32 to vector<1x128xf32>
      %41 = arith.mulf %40, %30 : vector<1x128xf32>
      %cst_34 = arith.constant 1.000000e+00 : f32
      %42 = arith.subf %cst_34, %16 : f32
      %43 = vector.broadcast %42 : f32 to vector<1x128xf32>
      %44 = arith.mulf %43, %36 : vector<1x128xf32>
      %45 = arith.addf %41, %44 : vector<1x128xf32>
      %46 = vector.broadcast %16 : f32 to vector<1x128xf32>
      %47 = arith.mulf %46, %33 : vector<1x128xf32>
      %cst_35 = arith.constant 1.000000e+00 : f32
      %48 = arith.subf %cst_35, %16 : f32
      %49 = vector.broadcast %48 : f32 to vector<1x128xf32>
      %50 = arith.mulf %49, %39 : vector<1x128xf32>
      %51 = arith.addf %47, %50 : vector<1x128xf32>
      %cst_36 = arith.constant 9.99999974E-6 : f32
      %52 = vector.broadcast %cst_36 : f32 to vector<1x128xf32>
      %53 = arith.addf %33, %52 : vector<1x128xf32>
      %54 = math.rsqrt %53 : vector<1x128xf32>
      %cst_37 = arith.constant 9.99999974E-6 : f32
      %55 = vector.broadcast %cst_37 : f32 to vector<1x128xf32>
      %56 = arith.addf %51, %55 : vector<1x128xf32>
      %57 = math.sqrt %56 : vector<1x128xf32>
      %58 = arith.mulf %54, %57 : vector<1x128xf32>
      %59 = arith.index_cast %arg9 : i32 to index
      %c0_38 = arith.constant 0 : index
      %c0_39 = arith.constant 0 : index
      %60 = vector.load %arg7[%59, %c0_38, %c0_39] : memref<2x1x128xf32, #tpu.memory_space<vmem>>, vector<1x1x128xf32>
      %61 = vector.shape_cast %60 : vector<1x1x128xf32> to vector<1x128xf32>
      %62 = vector.shape_cast %58 : vector<1x128xf32> to vector<1x1x128xf32>
      tpu.vector_store %arg7[%59, %c0_38, %c0_39], %62 {strides = array<i32>} : memref<2x1x128xf32, #tpu.memory_space<vmem>>, vector<1x1x128xf32>,
      %63 = arith.mulf %30, %58 : vector<1x128xf32>
      %64 = arith.subf %45, %63 : vector<1x128xf32>
      %65 = arith.index_cast %arg9 : i32 to index
      %c0_40 = arith.constant 0 : index
      %c0_41 = arith.constant 0 : index
      %66 = vector.load %arg8[%65, %c0_40, %c0_41] : memref<2x1x128xf32, #tpu.memory_space<vmem>>, vector<1x1x128xf32>
      %67 = vector.shape_cast %66 : vector<1x1x128xf32> to vector<1x128xf32>
      %68 = vector.shape_cast %64 : vector<1x128xf32> to vector<1x1x128xf32>
      tpu.vector_store %arg8[%65, %c0_40, %c0_41], %68 {strides = array<i32>} : memref<2x1x128xf32, #tpu.memory_space<vmem>>, vector<1x1x128xf32>,
    }
    %c2_i32_13 = arith.constant 2 : i32
    %c0_14 = arith.constant 0 : index
    %c0_15 = arith.constant 0 : index
    %c0_16 = arith.constant 0 : index
    %18 = vector.load %arg3[%c0_14, %c0_15, %c0_16] : memref<2x8x128xf32, #tpu.memory_space<vmem>>, vector<2x8x128xf32>
    %c0_17 = arith.constant 0 : index
    %c0_18 = arith.constant 0 : index
    %c0_19 = arith.constant 0 : index
    %19 = vector.load %arg7[%c0_17, %c0_18, %c0_19] : memref<2x1x128xf32, #tpu.memory_space<vmem>>, vector<2x1x128xf32>
    %20 = vector.broadcast %19 : vector<2x1x128xf32> to vector<2x8x128xf32>
    %21 = arith.mulf %18, %20 : vector<2x8x128xf32>
    %c0_20 = arith.constant 0 : index
    %c0_21 = arith.constant 0 : index
    %c0_22 = arith.constant 0 : index
    %22 = vector.load %arg8[%c0_20, %c0_21, %c0_22] : memref<2x1x128xf32, #tpu.memory_space<vmem>>, vector<2x1x128xf32>
    %23 = vector.broadcast %22 : vector<2x1x128xf32> to vector<2x8x128xf32>
    %24 = arith.addf %21, %23 : vector<2x8x128xf32>
    %c0_23 = arith.constant 0 : index
    %c0_24 = arith.constant 0 : index
    %c0_25 = arith.constant 0 : index
    %25 = vector.load %arg4[%c0_23, %c0_24, %c0_25] : memref<2x8x128xf32, #tpu.memory_space<vmem>>, vector<2x8x128xf32>
    tpu.vector_store %arg4[%c0_23, %c0_24, %c0_25], %24 {strides = array<i32>} : memref<2x8x128xf32, #tpu.memory_space<vmem>>, vector<2x8x128xf32>,
    return
  }
  func.func @transform_0(%arg0: i32, %arg1: memref<2xi32, #tpu.memory_space<smem>>, %arg2: memref<1xf32, #tpu.memory_space<smem>>) -> (i32, i32, i32) {
    %c0_i32 = arith.constant 0 : i32
    %c0_i32_0 = arith.constant 0 : i32
    %c0_i32_1 = arith.constant 0 : i32
    return %c0_i32, %c0_i32_0, %arg0 : i32, i32, i32
  }
  func.func @transform_1(%arg0: i32, %arg1: memref<2xi32, #tpu.memory_space<smem>>, %arg2: memref<1xf32, #tpu.memory_space<smem>>) -> (i32, i32, i32) {
    %c0_i32 = arith.constant 0 : i32
    %c0_i32_0 = arith.constant 0 : i32
    %c0_i32_1 = arith.constant 0 : i32
    return %c0_i32, %c0_i32_0, %arg0 : i32, i32, i32
  }
}

</mosaic_0001>

<bundles_post_ra>
// kernel: token_randomization.1
= control target key start
LH: loop header
LB: loop body
LE: loop exit
PB: predicated region body
PF: predicated region fallthrough
CT: control target
= control target key end

     0   :  { %s290_s0 = inlined_call_operand.vmem [shape: s32[2], index: 0, kind: input, shape index: {}]   ;;  %s291_s1 = inlined_call_operand.<no memory space> [shape: f32[1], index: 1, kind: input, shape index: {}]   ;;  %s292_s2 = inlined_call_operand.vmem [shape: f32[2,8,128], index: 2, kind: input, shape index: {}]   ;;  %s293_s3 = inlined_call_operand.hbm [shape: f32[2,8,128], index: 3, kind: output, shape index: {}]  }
   0x1   :  { %s8_s14 = sshll.u32 %s290_s0, 4  ;;  %s9_s14 = int_to_ptr.vmem [resolvable:$true] %s8_s14 }
   0x2   :  { %s185_s15 = scalar_lea.vmem %s9_s14, 16  ;;  %p190_p1 = scmp.lt.s32.totalorder %s9_s14, %s9_s14 }
   0x3   :  { %p186_p0 = scmp.ne.s32.totalorder %s9_s14, %s185_s15  ;;  %p191_p2 = scmp.lt.s32.totalorder %s185_s15, %s185_s15 }
   0x5   :  { %p192_p3 = por %p191_p2, %p190_p1 }
   0x7   :  { %p193_p4 = pnand %p192_p3, %p186_p0 }
   0x9   :  { %196 = shalt.err (!%p193_p4)  }
   0xa   :  { %s229_s16 = smov [#allocation7]  }
   0xb   :  { %11 = dma.vmem_to_smem %s9_s14, 16, %s229_s16, [#allocation6] }
   0xc   :  { %221 = dma.done.wait [#allocation6], 16 }
   0xd   :  { %222 = vsyncadd [#allocation6], 4294967280 }
   0xe   :  { %14 = sfence }
   0xf   :  { %15 = vsyncpa [#allocation10], 0  ;;  %v18_v0 = vld [vmem:[%s292_s2] sm:$0xff]  ;;  %v19_v1 = vld [vmem:[%s292_s2 + $0x8] sm:$0xff]  ;;  %s262_s20 = smov 0  }
  0x10   :  { %v20_v2 = vrot.slane %v18_v0, 4  ;;  %v26_v3 = vrot.slane %v19_v1, 4  ;;  %v34_v4 = vmul.f32 %v18_v0, %v18_v0  ;;  %v35_v5 = vmul.f32 %v19_v1, %v19_v1 }
  0x12   :  { %v21_v6 = vadd.f32 %v20_v2, %v18_v0  ;;  %v27_v7 = vadd.f32 %v26_v3, %v19_v1  ;;  %v36_v8 = vrot.slane %v34_v4, 4  ;;  %v42_v9 = vrot.slane %v35_v5, 4 }
  0x14   :  { %v22_v10 = vrot.slane %v21_v6, 2  ;;  %v28_v11 = vrot.slane %v27_v7, 2  ;;  %v37_v12 = vadd.f32 %v36_v8, %v34_v4  ;;  %v43_v13 = vadd.f32 %v42_v9, %v35_v5 }
  0x16   :  { %v23_v14 = vadd.f32 %v22_v10, %v21_v6  ;;  %v29_v15 = vadd.f32 %v28_v11, %v27_v7  ;;  %v38_v16 = vrot.slane %v37_v12, 2  ;;  %v44_v17 = vrot.slane %v43_v13, 2 }
  0x18   :  { %v24_v18 = vrot.slane %v23_v14, 1  ;;  %v30_v19 = vrot.slane %v29_v15, 1  ;;  %v39_v20 = vadd.f32 %v38_v16, %v37_v12  ;;  %v45_v21 = vadd.f32 %v44_v17, %v43_v13 }
  0x1a   :  { %v25_v22 = vadd.f32 %v24_v18, %v23_v14  ;;  %v31_v23 = vadd.f32 %v30_v19, %v29_v15  ;;  %v40_v24 = vrot.slane %v39_v20, 1  ;;  %v46_v25 = vrot.slane %v45_v21, 1 }
  0x1c   :  { %v32_v26 = vmul.f32 0.125, %v25_v22  ;;  %v33_v27 = vmul.f32 0.125, %v31_v23  ;;  %v41_v28 = vadd.f32 %v40_v24, %v39_v20  ;;  %v47_v29 = vadd.f32 %v46_v25, %v45_v21 }
  0x1e   :  { %48 = vst [vmem:[#allocation2] sm:$0x1] %v32_v26  ;;  %49 = vst [vmem:[#allocation2 + $0x1] sm:$0x1] %v33_v27  ;;  %v50_v30 = vmul.f32 %v32_v26, %v25_v22  ;;  %v51_v31 = vmul.f32 %v33_v27, %v31_v23 }
  0x20   :  { %v52_v32 = vsub.f32 %v41_v28, %v50_v30  ;;  %v53_v33 = vsub.f32 %v47_v29, %v51_v31 }
  0x22   :  { %v54_v34 = vmax.f32 %v52_v32, 0.0  ;;  %v55_v35 = vmax.f32 %v53_v33, 0.0 }
  0x24   :  { %v56_v36 = vmul.f32 0.14285715, %v54_v34  ;;  %v57_v37 = vmul.f32 0.14285715, %v55_v35 }
  0x26   :  { %58 = vst [vmem:[#allocation3] sm:$0x1] %v56_v36  ;;  %59 = vst [vmem:[#allocation3 + $0x1] sm:$0x1] %v57_v37 }
  0x27 LB: > { %s67_s21 = sld [smem:[#allocation7 + %s227_s20]]  ;;  %s70_s25 = scalar_lea.vmem [#allocation3], %s227_s20  ;;  %v76_v39 = vstv %s291_s1  ;;  %s227_s20 = sphi %s262_s20, %s66_s20  }
  0x28   : > { %s78_s24 = ssub.f32 1.0, %s291_s1  ;;  %s68_s29 = scalar_lea.vmem [#allocation2], %s227_s20 }
  0x29   : > { %v69_v47 = vld [vmem:[%s68_s29] sm:$0x1]  ;;  %s96_s4 = scalar_lea.vmem [#allocation4], %s227_s20  ;;  %s100_s5 = scalar_lea.vmem [#allocation5], %s227_s20 }
  0x2a   : > { %v79_v40 = vstv %s78_s24  ;;  %v77_v52 = vmul.f32 %v76_v39, %v69_v47  ;;  %s66_s20 = sadd.s32 1, %s227_s20  }
  0x2b   : > { %p63_p5 = scmp.ge.s32.totalorder %s66_s20, 2  }
  0x2c   :  { %v102_v61 = vld [vmem:[%s292_s2] sm:$0xff] (%p63_p5)  ;;  %v103_v1 = vld [vmem:[%s292_s2 + $0x8] sm:$0xff] (%p63_p5)  ;;  %s230_s10 = smov (%p63_p5), [#allocation9]  }
  0x2d   : > { %v71_v38 = vld [vmem:[%s70_s25] sm:$0x1]  ;;  %s74_s28 = scalar_lea.vmem [#allocation3], %s67_s21  ;;  %s72_s30 = scalar_lea.vmem [#allocation2], %s67_s21 }
  0x2e   : > { %v82_v41 = vmul.f32 %v76_v39, %v71_v38  ;;  %v75_v42 = vld [vmem:[%s74_s28] sm:$0x1]  ;;  %v85_v45 = vadd.f32 1e-05, %v71_v38  ;;  %s143_s11 = sshll.u32 (%p63_p5), %s230_s10, 4  ;;  %s144_s11 = int_to_ptr.vmem [resolvable:$true] %s143_s11 }
  0x2f   : > { %v83_v43 = vmul.f32 %v79_v40, %v75_v42  ;;  %v73_v48 = vld [vmem:[%s72_s30] sm:$0x1]  ;;  %s197_s1 = scalar_lea.vmem (%p63_p5), %s144_s11, 256  ;;  %p202_p7 = scmp.lt.s32.totalorder (%p63_p5), %s144_s11, %s144_s11 }
  0x30   : > { %v80_v53 = vmul.f32 %v79_v40, %v73_v48  ;;  %p198_p6 = scmp.ne.s32.totalorder (%p63_p5), %s144_s11, %s197_s1  ;;  %p203_p8 = scmp.lt.s32.totalorder (%p63_p5), %s197_s1, %s197_s1 }
  0x31   : > { %v84_v44 = vadd.f32 %v83_v43, %v82_v41 }
  0x32   : > { %v81_v58 = vadd.f32 %v80_v53, %v77_v52  ;;  %p204_p9 = por (%p63_p5), %p203_p8, %p202_p7 }
  0x33   : > { %v87_v46 = vadd.f32 1e-05, %v84_v44 }
  0x34   :  { %p205_p10 = pnand (%p63_p5), %p204_p9, %p198_p6 }
  0x35   : > { %181 = vrsqrt.f32 %v87_v46  ;;  %vm90_vm0 = vcmp.eq.f32.partialorder %v87_v46, inf  ;;  %v93_v50 = vand.u32 2147483648, %v87_v46  ;;  %vm92_vm1 = vcmp.eq.f32.partialorder %v87_v46, 0.0 }
  0x36   : > { %183 = vrsqrt.f32 %v85_v45 }
  0x42   : > { %v182_v49 = vpop.eup %181 }
  0x43   : > { %v89_v51 = vmul.f32 %v182_v49, %v87_v46  ;;  %v184_v54 = vpop.eup %183 }
  0x45   : > { %v91_v55 = vsel %vm90_vm0, %v87_v46, %v89_v51 }
  0x46   : > { %v94_v56 = vsel %vm92_vm1, %v93_v50, %v91_v55 }
  0x47   : > { %v95_v57 = vmul.f32 %v184_v54, %v94_v56 }
  0x49   : > { %97 = vst [vmem:[%s96_s4] sm:$0x1] %v95_v57  ;;  %v98_v59 = vmul.f32 %v95_v57, %v69_v47  ;;  %65 = sbr.rel (!%p63_p5) target bundleno = 39 (0x27), region = 37 }
  0x4b   : > { %v99_v60 = vsub.f32 %v81_v58, %v98_v59 }
  0x4d   : > { %101 = vst [vmem:[%s100_s5] sm:$0x1] %v99_v60 }
  0x50   :  { %v165_v62 = vld [vmem:[#allocation4] ss:$0 sm:$0xff]  ;;  %v166_v2 = vld [vmem:[#allocation4 + $0x1] ss:$0 sm:$0xff] }
  0x51   :  { %v118_v0 = vmul.f32 %v165_v62, %v102_v61  ;;  %v119_v4 = vmul.f32 %v166_v2, %v103_v1 }
  0x54   :  { %v167_v63 = vld [vmem:[#allocation5] ss:$0 sm:$0xff]  ;;  %v168_v3 = vld [vmem:[#allocation5 + $0x1] ss:$0 sm:$0xff] }
  0x55   :  { %v134_v5 = vadd.f32 %v167_v63, %v118_v0  ;;  %v135_v6 = vadd.f32 %v168_v3, %v119_v4 }
  0x57   :  { %136 = vst [vmem:[#allocation9] sm:$0xff] %v134_v5  ;;  %137 = vst [vmem:[#allocation9 + $0x8] sm:$0xff] %v135_v6 }
  0x58   :  { %208 = shalt.err (!%p205_p10)
}
  0x59   :  { %s231_s12 = smov 128   ;;  %s232_s13 = smov 8  }
  0x5a   :  { %149 = dma.vmem_to_hbm [thread:$0]  %s144_s11, 256, %s293_s3, [#allocation10], %s231_s12, %s231_s12, %s232_s13  }
  0x5b   :  { %223 = dma.done.wait [#allocation10], 256  }
  0x5c   :  { %224 = vsyncadd [#allocation10], 4294967040 }
  0x5d   :  { %153 = vsyncpa [#allocation10], 1 }

</bundles_post_ra>
